<compile_context>
chip_gen: v7x
topology: tpu7x:2x2x1
jax: 0.10.0
libtpu: 0.0.40
codegen_flags: <defaults>
</compile_context>

<pallas_src>
from typing import List, Tuple

import jax
import jax.numpy as jnp
from jax import lax
from jax.experimental import pallas as pl
from jax.experimental.pallas import tpu as pltpu

_LANE = 128             # TPU lane width; batch tiles are multiples of this.
_TARGET_GRID_STEPS = 4  # keep >= 4 grid steps when possible (2 TCs on v7x, >=2 tiles/TC).


# ----------------------------------------------------------------------------- kernel
def _make_mlp_kernel(num_layers: int):
    """Kernel refs: (x_fm, W0, b0, W1, b1, ..., W_{L-1}, b_{L-1}, out_fm).

    Parameters are the FOLDED layer list (the un-activated input linear is already
    composed into the first hidden linear by the wrapper), so tanh follows every
    layer except the last -- exactly equivalent to the PyTorch forward.
    Activations are feature-major: (features, block_batch).
    """

    def kernel(*refs):
        x_ref = refs[0]
        out_ref = refs[-1]
        param_refs = refs[1:-1]

        h = x_ref[...]                          # (in_dim, blk), f32, batch on lanes
        for l in range(num_layers):
            w = param_refs[2 * l][...]          # (out_l, in_l) -- PyTorch layout
            b = param_refs[2 * l + 1][...]      # (out_l, 1)    -- lane broadcast
            h = jnp.dot(w, h, preferred_element_type=jnp.float32) + b
            if l < num_layers - 1:              # tanh on all but the output layer
                h = jnp.tanh(h)
        out_ref[...] = h.astype(out_ref.dtype)

    return kernel


# ----------------------------------------------------------------------------- wrapper
def _round_up(n: int, m: int) -> int:
    return ((n + m - 1) // m) * m


def _fold_input_layer(params):
    """Compose the (un-activated) input linear into the next layer. Exact in f32."""
    w0, b0 = params[0]
    if len(params) == 1:
        return [(w0, b0)]
    w1, b1 = params[1]
    hp = lax.Precision.HIGHEST  # tiny host-side composes; keep them exact f32
    w_f = jnp.dot(w1, w0, precision=hp)
    b_f = jnp.dot(w1, b0, precision=hp) + b1
    return [(w_f, b_f)] + list(params[2:])


def linear_network_forward(x: jax.Array,
                           params: List[Tuple[jax.Array, jax.Array]],
                           *,
                           block_batch: int = 8192,
                           features_major: bool = False) -> jax.Array:
    """Runs the whole MLP in one pallas_call, tiled over the batch dimension.

    x:      (batch, in_features) -- PyTorch nn.Linear convention -- or
            (in_features, batch) if features_major=True (skips the transpose pass).
    params: list of (W, b) for [input_linear, *hidden_linears, output_linear] in
            PyTorch layout: W is (out_features, in_features), b is (out_features,).
    Returns (batch, out_features).
    """
    assert x.ndim == 2
    if features_major:
        in_dim, batch = x.shape
        x_fm = x
    else:
        batch, in_dim = x.shape
        x_fm = x.T  # small HBM pass; pass features_major=True to avoid it (v5e win)
    assert params[0][0].shape[1] == in_dim, "first weight must match input_dim"

    folded = _fold_input_layer(params)
    num_layers = len(folded)
    out_dim = folded[-1][0].shape[0]

    # Lane-dense batch tile, capped so the "parallel" grid has >= _TARGET_GRID_STEPS
    # steps when the batch is large enough (megacore on v7x) and >= 128 always.
    padded = _round_up(batch, _LANE)
    cap = max(_LANE, ((padded // _TARGET_GRID_STEPS) // _LANE) * _LANE)
    blk = max(_LANE, (min(block_batch, cap) // _LANE) * _LANE)
    padded = _round_up(padded, blk)

    # Zero-pad padded batch columns; they are computed and sliced away below and
    # never affect returned values (batch columns are independent).
    if padded != batch:
        x_fm = jnp.pad(x_fm, ((0, 0), (0, padded - batch)))

    flat_params = []
    for w, b in folded:
        flat_params.append(w)                 # (out, in) -- resident in VMEM
        flat_params.append(b.reshape(-1, 1))  # (out, 1)  -- broadcasts along lanes

    in_specs = [pl.BlockSpec((in_dim, blk), lambda i: (0, i))]
    for arr in flat_params:
        # Full-array, constant-index blocks: weights/biases are DMA'd once and stay
        # resident in VMEM across every grid step (total footprint ~20 KB).
        in_specs.append(pl.BlockSpec(arr.shape, lambda i: (0, 0)))
    out_spec = pl.BlockSpec((out_dim, blk), lambda i: (0, i))

    # Advisory cost hint for XLA's scheduler.
    flops = sum(2 * int(w.shape[0]) * int(w.shape[1]) * padded for w, _ in folded)
    transcendentals = sum(int(w.shape[0]) * padded for w, _ in folded[:-1])
    bytes_accessed = 4 * (in_dim * padded + out_dim * padded +
                          sum(int(w.size) + int(b.size) for w, b in folded))

    y_fm = pl.pallas_call(
        _make_mlp_kernel(num_layers),
        grid=(padded // blk,),
        in_specs=in_specs,
        out_specs=out_spec,
        out_shape=jax.ShapeDtypeStruct((out_dim, padded), x.dtype),
        compiler_params=pltpu.CompilerParams(
            dimension_semantics=("parallel",)),   # batch tiles shard across TCs (v7x)
        cost_estimate=pl.CostEstimate(
            flops=int(flops),
            transcendentals=int(transcendentals),
            bytes_accessed=int(bytes_accessed)),
    )(x_fm, *flat_params)

    # (out_dim, padded) -> (batch, out_features); trivial for out_dim == 1.
    return y_fm[:, :batch].T


# ----------------------------------------------------------------------------- params
def init_linear_network_params(key: jax.Array,
                               input_dim: int,
                               output_dim: int,
                               hidden_layers: List[int]):
    """PyTorch-style init: U(-1/sqrt(fan_in), 1/sqrt(fan_in)), weights (out, in)."""
    dims = [input_dim] + list(hidden_layers) + [output_dim]
    params = []
    for i in range(len(dims) - 1):
        fan_in, fan_out = dims[i], dims[i + 1]
        key, kw, kb = jax.random.split(key, 3)
        bound = 1.0 / float(fan_in) ** 0.5
        w = jax.random.uniform(kw, (fan_out, fan_in), jnp.float32, -bound, bound)
        b = jax.random.uniform(kb, (fan_out,), jnp.float32, -bound, bound)
        params.append((w, b))
    return params


def _reference_forward(x, params):
    """Pure-JAX reference of the ORIGINAL (unfolded) PyTorch forward, full f32 dots."""
    n = len(params)
    hp = lax.Precision.HIGHEST
    h = x
    for l, (w, b) in enumerate(params):
        h = jnp.dot(h, w.T, precision=hp) + b
        if 0 < l < n - 1:
            h = jnp.tanh(h)
    return h


# ----------------------------------------------------------------------------- main
if __name__ == "__main__":
    # PINN-style problem: 3 coordinates (x, y, t) in, 1 field value out.
    input_dim = 3
    output_dim = 1
    hidden_layers = [32, 32, 32]

    key = jax.random.PRNGKey(0)
    key, kx1, kx2 = jax.random.split(key, 3)
    params = init_linear_network_params(key, input_dim, output_dim, hidden_layers)

    # Tolerance note: the reference uses full-f32 dots; the kernel uses the MXU's
    # default f32 path.  The loose bound covers a possible bf16-pass lowering of f32
    # matmuls while still catching any structural bug (wrong layer/activation).
    ATOL = RTOL = 1e-2

    # Case 1: batch a multiple of 128 -> 4 grid steps (pipelined / megacore path).
    x1 = jax.random.normal(kx1, (512, input_dim), jnp.float32)
    y1 = jax.block_until_ready(linear_network_forward(x1, params))
    y1_ref = _reference_forward(x1, params)
    assert y1.shape == (512, output_dim)
    assert jnp.allclose(y1, y1_ref, atol=ATOL, rtol=RTOL), "mismatch vs reference (case 1)"

    # Case 2: ragged batch (not a multiple of 128) -> exercises the padding path.
    x2 = jax.random.normal(kx2, (200, input_dim), jnp.float32)
    y2 = jax.block_until_ready(linear_network_forward(x2, params))
    y2_ref = _reference_forward(x2, params)
    assert y2.shape == (200, output_dim)
    assert jnp.allclose(y2, y2_ref, atol=ATOL, rtol=RTOL), "mismatch vs reference (case 2)"

    # Case 3: coordinate-major input path (data pipeline supplies (in_dim, batch);
    # skips the wrapper-side transpose HBM pass).
    y3 = jax.block_until_ready(
        linear_network_forward(jnp.asarray(x1.T), params, features_major=True))
    assert y3.shape == (512, output_dim)
    assert jnp.allclose(y3, y1_ref, atol=ATOL, rtol=RTOL), "mismatch vs reference (case 3)"

    print("KERNEL_OK")
</pallas_src>

<mosaic_0001>
module attributes {stable_mosaic.version = 11 : i64} {
  func.func @kernel(%arg0: i32, %arg1: memref<3x128xf32, #tpu.memory_space<vmem>>, %arg2: memref<32x3xf32, #tpu.memory_space<vmem>>, %arg3: memref<32x1xf32, #tpu.memory_space<vmem>>, %arg4: memref<32x32xf32, #tpu.memory_space<vmem>>, %arg5: memref<32x1xf32, #tpu.memory_space<vmem>>, %arg6: memref<1x32xf32, #tpu.memory_space<vmem>>, %arg7: memref<1x1xf32, #tpu.memory_space<vmem>>, %arg8: memref<1x128xf32, #tpu.memory_space<vmem>>) attributes {dimension_semantics = [#tpu.dimension_semantics<parallel>], iteration_bounds = array<i64: 4>, scalar_prefetch = 0 : i64, scratch_operands = 0 : i64, tpu.core_type = #tpu.core_type<tc>, window_params = [{transform_indices = @transform_0, window_bounds = array<i64: 3, 128>}, {pipeline_mode = #tpu.pipeline_mode<synchronous>, transform_indices = @transform_1, window_bounds = array<i64: 32, 3>}, {pipeline_mode = #tpu.pipeline_mode<synchronous>, transform_indices = @transform_2, window_bounds = array<i64: 32, 1>}, {pipeline_mode = #tpu.pipeline_mode<synchronous>, transform_indices = @transform_3, window_bounds = array<i64: 32, 32>}, {pipeline_mode = #tpu.pipeline_mode<synchronous>, transform_indices = @transform_4, window_bounds = array<i64: 32, 1>}, {pipeline_mode = #tpu.pipeline_mode<synchronous>, transform_indices = @transform_5, window_bounds = array<i64: 1, 32>}, {pipeline_mode = #tpu.pipeline_mode<synchronous>, transform_indices = @transform_6, window_bounds = array<i64: 1, 1>}, {transform_indices = @transform_7, window_bounds = array<i64: 1, 128>}]} {
    %c0 = arith.constant 0 : index
    %c0_0 = arith.constant 0 : index
    %0 = vector.load %arg1[%c0, %c0_0] : memref<3x128xf32, #tpu.memory_space<vmem>>, vector<3x128xf32>
    %c0_1 = arith.constant 0 : index
    %c0_2 = arith.constant 0 : index
    %1 = vector.load %arg2[%c0_1, %c0_2] : memref<32x3xf32, #tpu.memory_space<vmem>>, vector<32x3xf32>
    %c0_3 = arith.constant 0 : index
    %c0_4 = arith.constant 0 : index
    %2 = vector.load %arg3[%c0_3, %c0_4] : memref<32x1xf32, #tpu.memory_space<vmem>>, vector<32x1xf32>
    %cst = arith.constant dense<0.000000e+00> : vector<32x128xf32>
    %3 = tpu.matmul %1, %0, %cst {dimension_numbers = #tpu.dot_dimension_numbers<[1], [0], [0], [1], [0, 0, 1, 1], [], []>} : vector<32x3xf32>, vector<3x128xf32>, vector<32x128xf32> -> vector<32x128xf32>
    %4 = vector.broadcast %2 : vector<32x1xf32> to vector<32x128xf32>
    %5 = arith.addf %3, %4 : vector<32x128xf32>
    %6 = math.tanh %5 : vector<32x128xf32>
    %c0_5 = arith.constant 0 : index
    %c0_6 = arith.constant 0 : index
    %7 = vector.load %arg4[%c0_5, %c0_6] : memref<32x32xf32, #tpu.memory_space<vmem>>, vector<32x32xf32>
    %c0_7 = arith.constant 0 : index
    %c0_8 = arith.constant 0 : index
    %8 = vector.load %arg5[%c0_7, %c0_8] : memref<32x1xf32, #tpu.memory_space<vmem>>, vector<32x1xf32>
    %cst_9 = arith.constant dense<0.000000e+00> : vector<32x128xf32>
    %9 = tpu.matmul %7, %6, %cst_9 {dimension_numbers = #tpu.dot_dimension_numbers<[1], [0], [0], [1], [0, 0, 1, 1], [], []>} : vector<32x32xf32>, vector<32x128xf32>, vector<32x128xf32> -> vector<32x128xf32>
    %10 = vector.broadcast %8 : vector<32x1xf32> to vector<32x128xf32>
    %11 = arith.addf %9, %10 : vector<32x128xf32>
    %12 = math.tanh %11 : vector<32x128xf32>
    %c0_10 = arith.constant 0 : index
    %c0_11 = arith.constant 0 : index
    %13 = vector.load %arg6[%c0_10, %c0_11] : memref<1x32xf32, #tpu.memory_space<vmem>>, vector<1x32xf32>
    %c0_12 = arith.constant 0 : index
    %c0_13 = arith.constant 0 : index
    %14 = vector.load %arg7[%c0_12, %c0_13] : memref<1x1xf32, #tpu.memory_space<vmem>>, vector<1x1xf32>
    %cst_14 = arith.constant dense<0.000000e+00> : vector<1x128xf32>
    %15 = tpu.matmul %13, %12, %cst_14 {dimension_numbers = #tpu.dot_dimension_numbers<[1], [0], [0], [1], [0, 0, 1, 1], [], []>} : vector<1x32xf32>, vector<32x128xf32>, vector<1x128xf32> -> vector<1x128xf32>
    %16 = vector.broadcast %14 : vector<1x1xf32> to vector<1x128xf32>
    %17 = arith.addf %15, %16 : vector<1x128xf32>
    %c0_15 = arith.constant 0 : index
    %c0_16 = arith.constant 0 : index
    %18 = vector.load %arg8[%c0_15, %c0_16] : memref<1x128xf32, #tpu.memory_space<vmem>>, vector<1x128xf32>
    tpu.vector_store %arg8[%c0_15, %c0_16], %17 {strides = array<i32>} : memref<1x128xf32, #tpu.memory_space<vmem>>, vector<1x128xf32>,
    return
  }
  func.func @transform_0(%arg0: i32) -> (i32, i32) {
    %c0_i32 = arith.constant 0 : i32
    %c0_i32_0 = arith.constant 0 : i32
    return %c0_i32, %arg0 : i32, i32
  }
  func.func @transform_1(%arg0: i32) -> (i32, i32) {
    %c0_i32 = arith.constant 0 : i32
    %c0_i32_0 = arith.constant 0 : i32
    %c0_i32_1 = arith.constant 0 : i32
    return %c0_i32, %c0_i32_0 : i32, i32
  }
  func.func @transform_2(%arg0: i32) -> (i32, i32) {
    %c0_i32 = arith.constant 0 : i32
    %c0_i32_0 = arith.constant 0 : i32
    %c0_i32_1 = arith.constant 0 : i32
    return %c0_i32, %c0_i32_0 : i32, i32
  }
  func.func @transform_3(%arg0: i32) -> (i32, i32) {
    %c0_i32 = arith.constant 0 : i32
    %c0_i32_0 = arith.constant 0 : i32
    %c0_i32_1 = arith.constant 0 : i32
    return %c0_i32, %c0_i32_0 : i32, i32
  }
  func.func @transform_4(%arg0: i32) -> (i32, i32) {
    %c0_i32 = arith.constant 0 : i32
    %c0_i32_0 = arith.constant 0 : i32
    %c0_i32_1 = arith.constant 0 : i32
    return %c0_i32, %c0_i32_0 : i32, i32
  }
  func.func @transform_5(%arg0: i32) -> (i32, i32) {
    %c0_i32 = arith.constant 0 : i32
    %c0_i32_0 = arith.constant 0 : i32
    %c0_i32_1 = arith.constant 0 : i32
    return %c0_i32, %c0_i32_0 : i32, i32
  }
  func.func @transform_6(%arg0: i32) -> (i32, i32) {
    %c0_i32 = arith.constant 0 : i32
    %c0_i32_0 = arith.constant 0 : i32
    %c0_i32_1 = arith.constant 0 : i32
    return %c0_i32, %c0_i32_0 : i32, i32
  }
  func.func @transform_7(%arg0: i32) -> (i32, i32) {
    %c0_i32 = arith.constant 0 : i32
    %c0_i32_0 = arith.constant 0 : i32
    return %c0_i32, %arg0 : i32, i32
  }
}

</mosaic_0001>

<bundles_post_ra>
// kernel: tpu_custom_call.1
= control target key start
LH: loop header
LB: loop body
LE: loop exit
PB: predicated region body
PF: predicated region fallthrough
CT: control target
= control target key end

     0   :  { %s1109_s0 = inlined_call_operand.vmem [shape: f32[3,512], index: 0, kind: input, shape index: {}]   ;;  %s1110_s1 = inlined_call_operand.vmem [shape: f32[32,3], index: 1, kind: input, shape index: {}]   ;;  %s1111_s2 = inlined_call_operand.vmem [shape: f32[32,1], index: 2, kind: input, shape index: {}]   ;;  %s1112_s3 = inlined_call_operand.vmem [shape: f32[32,32], index: 3, kind: input, shape index: {}]   ;;  %s1113_s4 = inlined_call_operand.vmem [shape: f32[32,1], index: 4, kind: input, shape index: {}]   ;;  %s1114_s5 = inlined_call_operand.vmem [shape: f32[1,32], index: 5, kind: input, shape index: {}]   ;;  %s1115_s6 = inlined_call_operand.<no memory space> [shape: f32[1,1], index: 6, kind: input, shape index: {}]   ;;  %s1116_s7 = inlined_call_operand.hbm [shape: f32[1,512], index: 7, kind: output, shape index: {}]  }
   0x1   :  { %v12_v0 = vstv %s1115_s6 }
   0x2   :  { %13 = vst [vmem:[#allocation2] sm:$0x1] %v12_v0 }
   0x3   :  { %14 = vsyncpa [#allocation4], 0 }
   0x4   :  { %16 = vsyncpa [#allocation4 + $0x1], 0  ;;  %s949_s26 = smov 0   ;;  %s951_s27 = smov 0  }
   0x5   :  { %s953_s28 = smov 0   ;;  %s955_s29 = smov 0  }
   0x6 LB: > { %s970_s6 = sadd.s32 4294967295, %s899_s29   ;;  %s693_s30 = sadd.s32 4294967294, %s899_s29   ;;  %s899_s29 = sphi %s955_s29, %s1122_s29   ;;  %s895_s28 = sphi %s953_s28, %s1121_s28   ;;  %s891_s27 = sphi %s951_s27, %s1120_s27   ;;  %s887_s26 = sphi %s949_s26, %s1119_s26  }
   0x7   : > { %s974_s8 = sadd.s32 1, %s899_s29   ;;  %s181_s9 = sadd.s32 1, %s895_s28 }
   0x8   : > { %s178_s10 = ssub.s32 %s899_s29, %s974_s8  ;;  %p191_p0 = scmp.ne.s32.totalorder %s895_s28, %s891_s27 }
   0x9   : > { %p179_p1 = scmp.eq.s32.totalorder %s178_s10, 0  ;;  %p192_p2 = scmp.eq.s32.totalorder %s970_s6, 3 }
   0xa   : > { %p197_p3 = scmp.ne.s32.totalorder %s891_s27, %s887_s26  ;;  %p198_p4 = scmp.eq.s32.totalorder %s693_s30, 3 }
   0xb   : > { %s985_s11 = scalar_select %p179_p1, %s895_s28, %s181_s9  }
   0xc   : > { %p987_p5 = por %p192_p2, %p191_p0  ;;  %p991_p6 = por %p198_p4, %p197_p3 }
   0xd   : > { %p696_p7 = scmp.ge.s32.totalorder %s899_s29, 1  ;;  %p241_p8 = scmp.lt.s32.totalorder %s899_s29, 5 }
   0xf   : > { %p242_p9 = pnand %p696_p7, %p241_p8 }
  0x10   : > { %p271_p10 = scmp.lt.s32.totalorder (!%p242_p9), %s970_s6, 3  ;;  %v276_v1 = vld [vmem:[%s1110_s1] sm:$0xff] (!%p242_p9)  ;;  %vm304_vm0 = vcmask (!%p242_p9), 23552   ;;  %v901_v3 = vmov (!%p242_p9), 0   ;;  %v282_v4 = vld [vmem:[%s1111_s2 + $0x10] sm:$0xff] (!%p242_p9)  ;;  %vm317_vm1 = vcmask (!%p242_p9), 1042432   ;;  %v547_v59 = vlaneseq (!%p242_p9) }
  0x11   : > { %245 = sbr.rel (%p242_p9) target bundleno = 730 (0x2da), region = 48  ;;  %731 = vmatprep.mubr.msk.f32.mxu0 (!%p242_p9), %vm304_vm0, %v276_v1  ;;  %v280_v2 = vld [vmem:[%s1111_s2] sm:$0xff] (!%p242_p9)  ;;  %819 = vset.pattern.permute.xlu0 (!%p242_p9), %v901_v3  ;;  %v281_v5 = vld [vmem:[%s1111_s2 + $0x8] sm:$0xff] (!%p242_p9)  ;;  %v283_v6 = vld [vmem:[%s1111_s2 + $0x18] sm:$0xff] (!%p242_p9)  ;;  %vm438_vm2 = vcmask (!%p242_p9), 261120   ;;  %v902_v38 = vmov (!%p242_p9), 0.0|0.0  }
  0x12   : > { %820 = vset.pattern.permute.xlu1 (!%p242_p9), %v901_v3  ;;  %286 = vperm.xlu0 (!%p242_p9), %819, %v280_v2   ;;  %v277_v8 = vld [vmem:[%s1110_s1 + $0x8] sm:$0xff] (!%p242_p9)  ;;  %v278_v9 = vld [vmem:[%s1110_s1 + $0x10] sm:$0xff] (!%p242_p9)  ;;  %v414_v10 = vld [vmem:[%s1113_s4] sm:$0xff] (!%p242_p9)  ;;  %vm903_vm3 = vmmov (!%p242_p9), 0   ;;  %v904_v39 = vmov (!%p242_p9), 0.0   ;;  %v548_v60 = vshrl.u32 (!%p242_p9), %v547_v59, 7 }
  0x13   : > { %296 = vperm.xlu1 (!%p242_p9), %820, %v282_v4   ;;  %v415_v11 = vld [vmem:[%s1113_s4 + $0x8] sm:$0xff] (!%p242_p9)  ;;  %v279_v12 = vld [vmem:[%s1110_s1 + $0x18] sm:$0xff] (!%p242_p9)  ;;  %v416_v13 = vld [vmem:[%s1113_s4 + $0x10] sm:$0xff] (!%p242_p9)  ;;  %s269_s23 = sand.u32 (!%p242_p9), 1, %s891_s27   ;;  %s708_s24 = sshll.u32 (!%p242_p9), %s970_s6, 4 }
  0x14   : > { %v417_v14 = vld [vmem:[%s1113_s4 + $0x18] sm:$0xff] (!%p242_p9)  ;;  %v541_v15 = vld [vmem:[#allocation2] sm:$0x1] (!%p242_p9)  ;;  %v411_v35 = vld [vmem:[%s1112_s3 + $0x8] sm:$0xff] (!%p242_p9)  ;;  %v549_v61 = vsub.s32 (!%p242_p9), 0, %v548_v60  ;;  %s270_s25 = scalar_lea.vmem (!%p242_p9), [#allocation3], %s269_s23  ;;  %s1067_s14 = scalar_lea.hbm (!%p242_p9), %s1116_s7, %s708_s24 }
  0x15   : > { %v410_v16 = vld [vmem:[%s1112_s3] sm:$0xff] (!%p242_p9)  ;;  %v412_v36 = vld [vmem:[%s1112_s3 + $0x10] sm:$0xff] (!%p242_p9)  ;;  %v413_v37 = vld [vmem:[%s1112_s3 + $0x18] sm:$0xff] (!%p242_p9)  ;;  %s626_s15 = scalar_lea.sflag (!%p242_p9), [#allocation4], %s269_s23 }
  0x16   : > { %291 = vperm.xlu0 (!%p242_p9), %819, %v281_v5   ;;  %745 = vmatprep.mubr.msk.f32.mxu1 (!%p242_p9), %vm438_vm2, %v410_v16  ;;  %v540_v58 = vld [vmem:[%s1114_s5] sm:$0x1] (!%p242_p9) }
  0x17   : > { %301 = vperm.xlu1 (!%p242_p9), %820, %v283_v6  }
  0x18   : > { %s272_s18 = scalar_select %p271_p10, %s970_s6, 3 }
  0x19   : > { %s905_s6 = smov [#allocation3]  }
  0x1a   : > { %s697_s21 = sshll.u32 %s272_s18, 2  ;;  %420 = vperm.xlu0 %819, %v414_v10   ;;  %s841_s17 = sshll.u32 %s905_s6, 4  ;;  %s842_s17 = int_to_ptr.vmem [resolvable:$false] %s841_s17 }
  0x1b   : > { %s274_s30 = scalar_lea.vmem %s1109_s0, %s697_s21  ;;  %425 = vperm.xlu1 %820, %v415_v11   ;;  %s843_s18 = scalar_lea.vmem %s842_s17, 32 }
  0x1c   : > { %v275_v7 = vld [vmem:[%s274_s30] sm:$0x7]  ;;  %s638_s30 = sshll.u32 %s270_s25, 4  ;;  %s1069_s30 = int_to_ptr.vmem [resolvable:$true] %s638_s30 }
  0x1d   : > { %729 = vmatprep.subr.msk.mxu0 %vm317_vm1, %v275_v7  ;;  %s837_s16 = scalar_lea.vmem %s1069_s30, 16  ;;  %p844_p0 = scmp.lt.s32.totalorder %s1069_s30, %s842_s17 }
  0x1e   : > { %730 = vmatpush3.msk.msra.mxu0 %vm317_vm1, %v275_v7  ;;  %430 = vperm.xlu0 %819, %v416_v13   ;;  %p838_p11 = scmp.ne.s32.totalorder %s1069_s30, %s837_s16  ;;  %p845_p1 = scmp.lt.s32.totalorder %s843_s18, %s837_s16 }
  0x1f   : > { %732 = vmatmul.mubr.msk.f32.vlgmr.msra.gmra.mrb[0].mxu0 %vm304_vm0, %v277_v8  ;;  %435 = vperm.xlu1 %820, %v417_v14  }
  0x20   : > { %734 = vmatprep.mubr.msk.f32.mxu0 %vm304_vm0, %v278_v9  ;;  %770 = vmatprep.subr.bf16.mxu0 %v902_v38  ;;  %p839_p12 = pnand %p838_p11, %p987_p5  ;;  %p846_p2 = por %p845_p1, %p844_p0 }
  0x22   : > { %544 = vperm.xlu0 %819, %v541_v15   ;;  %p840_p13 = pneg %p839_p12 }
  0x23   : > { %735 = vmatmul.mubr.msk.f32.gmra.mrb[2].mxu0 %vm304_vm0, %v279_v12 }
  0x24   : > { %759 = vmatprep.mubr.msk.f32.mxu0 %vm903_vm3, %v904_v39  ;;  %p847_p3 = pnand %p846_p2, %p840_p13 }
  0x91   : > { %v287_v17 = vpop.permute.xlu0 %286 }
  0x92   : > { %v297_v18 = vpop.permute.xlu1 %296 }
  0x95   : > { %v292_v19 = vpop.permute.xlu0 %291 }
  0x96   : > { %v302_v24 = vpop.permute.xlu1 %301 }
  0x99   : > { %v421_v41 = vpop.permute.xlu0 %420 }
  0x9a   : > { %v426_v40 = vpop.permute.xlu1 %425 }
  0x9d   : > { %v431_v48 = vpop.permute.xlu0 %430 }
  0x9e   : > { %v436_v46 = vpop.permute.xlu1 %435 }
  0xa1   : > { %v545_v62 = vpop.permute.xlu0 %544 }
  0xa2   : > { %v550_v63 = vrot.slane %v545_v62, %v549_v61 }
  0xf2   : > { %v733_v20 = vpop.f32.mrb[0].mxu0 }
  0xf3   : > { %v393_v21 = vadd.f32 %v733_v20, %v292_v19  ;;  %v387_v22 = vpop.f32.mrb[1].mxu0 }
  0xf4   : > { %v388_v23 = vadd.f32 %v387_v22, %v287_v17 }
  0xf5   : > { %821 = vtanh.f32 %v393_v21 }
  0xf6   : > { %823 = vtanh.f32 %v388_v23  ;;  %v736_v25 = vpop.f32.mrb[2].mxu0 }
  0xf7   : > { %v403_v26 = vadd.f32 %v736_v25, %v302_v24  ;;  %v397_v27 = vpop.f32.mrb[3].mxu0 }
  0xf8   : > { %v398_v28 = vadd.f32 %v397_v27, %v297_v18 }
  0xf9   : > { %825 = vtanh.f32 %v403_v26 }
  0xfa   : > { %827 = vtanh.f32 %v398_v28 }
  0xff   : > { %v822_v29 = vpop.eup %821 }
 0x100   : > { %v824_v30 = vpop.eup %823 }
 0x101   : > { %v762_v31 = vpack.c.bf16 %v822_v29, %v824_v30 }
 0x103   : > { %v826_v32 = vpop.eup %825  ;;  %763 = vmatprep.subr.bf16.mxu1 %v762_v31 }
 0x104   : > { %v828_v33 = vpop.eup %827  ;;  %765 = vmatpush3.bf16.msra.mxu1 %v762_v31 }
 0x105   : > { %v766_v34 = vpack.c.bf16 %v826_v32, %v828_v33 }
 0x107   : > { %767 = vmatprep.subr.bf16.mxu1 %v766_v34 }
 0x108   : > { %769 = vmatpush3.bf16.msra.mxu1 %v766_v34 }
 0x10b   : > { %746 = vmatmul.mubr.msk.f32.vlgmr.msra.gmra.mrb[0].mxu1 %vm438_vm2, %v411_v35 }
 0x10c   : > { %748 = vmatprep.mubr.msk.f32.mxu1 %vm438_vm2, %v412_v36 }
 0x10f   : > { %749 = vmatmul.mubr.msk.f32.gmra.mrb[2].mxu1 %vm438_vm2, %v413_v37 }
 0x1de   : > { %v747_v42 = vpop.f32.mrb[0].mxu1 }
 0x1df   : > { %v523_v43 = vadd.f32 %v747_v42, %v426_v40  ;;  %v517_v44 = vpop.f32.mrb[1].mxu1 }
 0x1e0   : > { %v518_v45 = vadd.f32 %v517_v44, %v421_v41 }
 0x1e1   : > { %829 = vtanh.f32 %v523_v43 }
 0x1e2   : > { %831 = vtanh.f32 %v518_v45  ;;  %v750_v47 = vpop.f32.mrb[2].mxu1 }
 0x1e3   : > { %v533_v49 = vadd.f32 %v750_v47, %v436_v46  ;;  %v527_v50 = vpop.f32.mrb[3].mxu1 }
 0x1e4   : > { %v528_v51 = vadd.f32 %v527_v50, %v431_v48 }
 0x1e5   : > { %833 = vtanh.f32 %v533_v49 }
 0x1e6   : > { %835 = vtanh.f32 %v528_v51 }
 0x1eb   : > { %v830_v52 = vpop.eup %829 }
 0x1ec   : > { %v832_v53 = vpop.eup %831 }
 0x1ed   : > { %v771_v54 = vpack.c.bf16 %v830_v52, %v832_v53 }
 0x1ef   : > { %v834_v55 = vpop.eup %833  ;;  %772 = vmatpush3.bf16.msra.mxu0 %v771_v54 }
 0x1f0   : > { %v836_v56 = vpop.eup %835  ;;  %773 = vmatprep.subr.bf16.mxu0 %v902_v38 }
 0x1f1   : > { %v774_v57 = vpack.c.bf16 %v834_v55, %v836_v56 }
 0x1f3   : > { %775 = vmatpush3.bf16.msra.mxu0 %v774_v57 }
 0x1f6   : > { %760 = vmatmul.mubr.msk.f32.vlgmr.msra.gmra.mrb[4].mxu0 %vm438_vm2, %v540_v58 }
 0x2c9   : > { %v620_v0 = vpop.f32.mrb[4].mxu0 }
 0x2ca   : > { %v621_v1 = vadd.f32 %v620_v0, %v550_v63  ;;  %v761_v2 = vpop.f32.mrb[5].mxu0 }
 0x2cc   : > { %624 = vst [vmem:[%s270_s25] sm:$0x1] %v621_v1 }
 0x2cd   : > { %850 = shalt.err (!%p847_p3)
}
 0x2ce   : > { %s851_s19 = scalar_lea.hbm %s1067_s14, 16  ;;  %s855_s22 = scalar_lea.hbm %s1116_s7, 64 }
 0x2cf   : > { %p852_p4 = scmp.ne.s32.totalorder %s1067_s14, %s851_s19  ;;  %p856_p9 = scmp.lt.u32.totalorder %s1067_s14, %s1116_s7 }
 0x2d0   : > { %p857_p10 = scmp.lt.u32.totalorder %s855_s22, %s851_s19  ;;  %p859_p12 = scmp.lt.u32.totalorder %s851_s19, %s1067_s14 }
 0x2d1   : > { %p853_p7 = pnand %p852_p4, %p987_p5 }
 0x2d2   : > { %p858_p11 = por %p857_p10, %p856_p9 }
 0x2d3   : > { %p854_p8 = pneg %p853_p7 }
 0x2d4   : > { %p860_p13 = por %p859_p12, %p858_p11 }
 0x2d6   : > { %p861_p0 = pnand %p860_p13, %p854_p8 }
 0x2d8   : > { %864 = shalt.err (!%p861_p0)
}
 0x2d9   : > { %776 = dma.vmem_to_hbm [thread:$0]  (%p987_p5), %s1069_s30, 16, %s1067_s14, %s626_s15  }
 0x2da PF: > { %p782_p1 = scmp.ge.s32.totalorder %s899_s29, 2  ;;  %s650_s25 = sand.u32 1, %s887_s26  }
 0x2db   : > { %s651_s9 = scalar_lea.sflag [#allocation4], %s650_s25 }
 0x2dc   : > { %p779_p2 = pnand %p782_p1, %p991_p6 }
 0x2de   : > { %882 = dma.done.wait (!%p779_p2), %s651_s9, 16  }
 0x2df   : > { %884 = vsyncadd (!%p779_p2), %s651_s9, 4294967280  ;;  %p19_p3 = scmp.ge.s32.totalorder %s974_s8, 6   ;;  %s1119_s26 = smov %s891_s27 }
 0x2e0   : > { %s1120_s27 = smov %s895_s28  ;;  %s1121_s28 = smov %s985_s11 }
 0x2e1   : > { %s1122_s29 = smov %s974_s8  ;;  %21 = sbr.rel (!%p19_p3) target bundleno = 6 (0x6), region = 83 }
 0x2e8   :  { %655 = vsyncpa [#allocation4], 1 }
 0x2e9   :  { %657 = vsyncpa [#allocation4 + $0x1], 1 }

</bundles_post_ra>
